<compile_context>
chip_gen: v7x
topology: tpu7x:2x2x1
jax: 0.10.0
libtpu: 0.0.40
codegen_flags: <defaults>
</compile_context>

<pallas_src>
import functools

import jax
import jax.numpy as jnp
from jax.experimental import pallas as pl
from jax.experimental.pallas import tpu as pltpu

LANES = 128
SUBLANES = 8
GROUP = SUBLANES * LANES  # elements per (8, 128) vreg group


def _detect_tpu():
    """Best-effort chip detection -> (num_tensorcores, is_v7x)."""
    try:
        d = jax.devices()[0]
        if d.platform != "tpu":
            return 1, False
        kind = str(getattr(d, "device_kind", "")).lower()
    except Exception:
        return 1, False
    if "v7" in kind or "tpu7" in kind:
        return 2, True          # v7x: 2 TensorCores per chip
    return 1, False             # v5e / v6e: 1 TensorCore


def _soft_jaccard_partial_kernel(yp_ref, yt_ref, out_ref, *,
                                 num_groups, tile_groups, tiles_per_chunk,
                                 first_masked_tile):
    k = pl.program_id(1)

    @pl.when(k == 0)
    def _():
        out_ref[...] = jnp.zeros_like(out_ref)

    yp = yp_ref[...].astype(jnp.float32)
    yt = yt_ref[...].astype(jnp.float32)

    def _accumulate(p, t):
        # (tile_groups, 8, 128) -> (8, 128): reduce over the leading
        # (non-layout) axis only; pure VPU adds, no XLU, no in-kernel reshape.
        out_ref[0, 0] += (p * t).sum(axis=0)
        out_ref[0, 1] += (p + t).sum(axis=0)

    if first_masked_tile is None:
        # Statically known: every tile is fully valid -> pure streaming.
        _accumulate(yp, yt)
    else:
        tile_idx = pl.program_id(0) * tiles_per_chunk + k

        @pl.when(tile_idx < first_masked_tile)
        def _():
            # Interior tiles: unmasked streaming accumulate.
            _accumulate(yp, yt)

        @pl.when(tile_idx >= first_masked_tile)
        def _():
            # Boundary tile (partial last tile) and/or clamped duplicate
            # overhang tile: zero out groups past the valid extent.
            gid = tile_idx * tile_groups + jax.lax.broadcasted_iota(
                jnp.int32, (tile_groups, SUBLANES, LANES), 0)
            valid = gid < num_groups
            _accumulate(jnp.where(valid, yp, 0.0), jnp.where(valid, yt, 0.0))


def _soft_jaccard_from_sums(intersection, total):
    eps = jnp.float32(1e-15)
    union = total - intersection
    return jnp.float32(1.0) - (intersection + eps) / (union + eps)


def soft_jaccard_loss(y_pred, y_true, *, tile_rows=None, num_chunks=None):
    """1 - (sum(p*t)+eps) / (sum(p)+sum(t)-sum(p*t)+eps), as in SoftJaccardLoss."""
    assert y_pred.shape == y_true.shape, "y_pred / y_true shape mismatch"
    n = int(y_pred.size)

    yp_flat = jnp.ravel(y_pred)
    yt_flat = jnp.ravel(y_true)

    # Tiny inputs: not worth a kernel launch.
    if n < GROUP:
        yp32 = yp_flat.astype(jnp.float32)
        yt32 = yt_flat.astype(jnp.float32)
        return _soft_jaccard_from_sums(
            jnp.sum(yp32 * yt32), jnp.sum(yp32) + jnp.sum(yt32))

    num_cores, is_v7x = _detect_tpu()

    # Pad to a multiple of 1024 so the (G, 8, 128) reshape is free metadata.
    # Padded zeros contribute exactly 0 to both sums -> no extra masking.
    pad = (-n) % GROUP
    if pad:
        # TODO(synk): one-time zero-pad copy for non-1024-aligned sizes; feed
        # 1024-aligned inputs (or pre-pad upstream) to keep this fully zero-copy.
        yp_flat = jnp.pad(yp_flat, (0, pad))
        yt_flat = jnp.pad(yt_flat, (0, pad))
    G = (n + pad) // GROUP
    yp3 = yp_flat.reshape(G, SUBLANES, LANES)
    yt3 = yt_flat.reshape(G, SUBLANES, LANES)

    # Tile sizing: large tiles amortize the ~0.35 us/step grid overhead
    # (matters most on v7x's 3.2 TB/s HBM). tile_rows=8192 -> 4 MiB f32 block.
    if tile_rows is None:
        tile_rows = 8192
    tg = max(1, min(tile_rows // SUBLANES, G))   # groups (of 8 rows) per tile
    num_tiles = -(-G // tg)

    # Chunk split across TensorCores: 2 on v7x, 1 on single-core v5e/v6e
    # (avoids the clamped duplicate tile / wasted DMA step on 1-TC chips).
    if num_chunks is None:
        num_chunks = num_cores
    nc = max(1, min(int(num_chunks), num_tiles))
    tiles_per_chunk = -(-num_tiles // nc)

    partial_last = (num_tiles * tg != G)
    overhang = (nc * tiles_per_chunk != num_tiles)
    if partial_last:
        first_masked_tile = num_tiles - 1
    elif overhang:
        first_masked_tile = num_tiles
    else:
        first_masked_tile = None               # no masking anywhere

    last_tile = num_tiles - 1
    if overhang:
        def in_map(c, k):
            return (jnp.minimum(c * tiles_per_chunk + k, last_tile), 0, 0)
    else:
        def in_map(c, k):
            return (c * tiles_per_chunk + k, 0, 0)

    # Deeper input buffering on v7x where per-step DMAs are short.
    buffers = 3 if is_v7x else 2
    if buffers == 2:
        in_spec = pl.BlockSpec((tg, SUBLANES, LANES), in_map)
    else:
        in_spec = pl.BlockSpec((tg, SUBLANES, LANES), in_map,
                               pipeline_mode=pl.Buffered(buffers))

    in_bytes_per_step = tg * GROUP * (yp3.dtype.itemsize + yt3.dtype.itemsize)
    vmem_cap = (48 << 20) if is_v7x else (100 << 20)
    vmem_limit = int(min(vmem_cap,
                         max(32 << 20, buffers * in_bytes_per_step + (4 << 20))))

    # CORE_PARALLEL actually splits the chunk axis across TensorCores (plain
    # "parallel" has near-zero codegen impact); only used on multi-core chips.
    use_core_parallel = (nc > 1) and (num_cores > 1)
    dim0 = pltpu.CORE_PARALLEL if use_core_parallel else "arbitrary"

    kernel = functools.partial(
        _soft_jaccard_partial_kernel,
        num_groups=G, tile_groups=tg, tiles_per_chunk=tiles_per_chunk,
        first_masked_tile=first_masked_tile)

    partials = pl.pallas_call(
        kernel,
        out_shape=jax.ShapeDtypeStruct((nc, 2, SUBLANES, LANES), jnp.float32),
        grid_spec=pltpu.PrefetchScalarGridSpec(
            num_scalar_prefetch=0,
            grid=(nc, tiles_per_chunk),
            in_specs=[in_spec, in_spec],
            out_specs=pl.BlockSpec((1, 2, SUBLANES, LANES),
                                   lambda c, k: (c, 0, 0, 0)),
        ),
        compiler_params=pltpu.CompilerParams(
            dimension_semantics=(dim0, "arbitrary"),
            vmem_limit_bytes=vmem_limit,
        ),
    )(yp3, yt3)

    intersection = jnp.sum(partials[:, 0])
    total = jnp.sum(partials[:, 1])
    return _soft_jaccard_from_sums(intersection, total)


def soft_jaccard_loss_ref(y_pred, y_true):
    yp = y_pred.astype(jnp.float32)
    yt = y_true.astype(jnp.float32)
    intersection = jnp.sum(yp * yt)
    union = jnp.sum(yp) + jnp.sum(yt) - intersection
    return 1.0 - (intersection + 1e-15) / (union + 1e-15)


if __name__ == "__main__":
    key = jax.random.PRNGKey(0)
    k1, k2, k3, k4 = jax.random.split(key, 4)

    # NCHW inputs, consistent with the PyTorch module's typical usage.
    shape = (2, 4, 16, 16)   # 2048 elements -> zero-copy (G=2) streaming path
    y_pred = jax.nn.sigmoid(jax.random.normal(k1, shape, dtype=jnp.float32))
    y_true = (jax.random.uniform(k2, shape) > 0.5).astype(jnp.float32)

    loss = soft_jaccard_loss(y_pred, y_true)
    jax.block_until_ready(loss)
    ref = soft_jaccard_loss_ref(y_pred, y_true)
    assert jnp.allclose(loss, ref, rtol=1e-5, atol=1e-6), (loss, ref)

    # Exercise the gated-mask boundary path (partial last tile + multi-chunk
    # accumulation) with a small forced tile size.
    shape2 = (4, 4, 32, 32)  # 16384 elements -> G=16 groups
    y_pred2 = jax.nn.sigmoid(jax.random.normal(k3, shape2, dtype=jnp.float32))
    y_true2 = (jax.random.uniform(k4, shape2) > 0.5).astype(jnp.float32)
    loss2 = soft_jaccard_loss(y_pred2, y_true2, tile_rows=24, num_chunks=2)
    jax.block_until_ready(loss2)
    ref2 = soft_jaccard_loss_ref(y_pred2, y_true2)
    assert jnp.allclose(loss2, ref2, rtol=1e-5, atol=1e-6), (loss2, ref2)

    print("KERNEL_OK")
</pallas_src>

<mosaic_0001>
module attributes {stable_mosaic.version = 11 : i64} {
  func.func @_soft_jaccard_partial_kernel(%arg0: i32, %arg1: i32, %arg2: memref<2x8x128xf32, #tpu.memory_space<vmem>>, %arg3: memref<2x8x128xf32, #tpu.memory_space<vmem>>, %arg4: memref<1x2x8x128xf32, #tpu.memory_space<vmem>>) attributes {dimension_semantics = [#tpu.dimension_semantics<arbitrary>, #tpu.dimension_semantics<arbitrary>], iteration_bounds = array<i64: 1, 1>, scalar_prefetch = 0 : i64, scratch_operands = 0 : i64, tpu.core_type = #tpu.core_type<tc>, window_params = [{transform_indices = @transform_0, window_bounds = array<i64: 2, 8, 128>}, {transform_indices = @transform_1, window_bounds = array<i64: 2, 8, 128>}, {transform_indices = @transform_2, window_bounds = array<i64: 1, 2, 8, 128>}]} {
    %c0_i32 = arith.constant 0 : i32
    %0 = arith.cmpi eq, %arg1, %c0_i32 : i32
    %1 = arith.extui %0 : i1 to i32
    %c0_i32_0 = arith.constant 0 : i32
    %2 = arith.cmpi ne, %1, %c0_i32_0 : i32
    scf.if %2 {
      %cst_22 = arith.constant 0.000000e+00 : f32
      %21 = vector.broadcast %cst_22 : f32 to vector<1x2x8x128xf32>
      %c0_23 = arith.constant 0 : index
      %c0_24 = arith.constant 0 : index
      %c0_25 = arith.constant 0 : index
      %c0_26 = arith.constant 0 : index
      %22 = vector.load %arg4[%c0_23, %c0_24, %c0_25, %c0_26] : memref<1x2x8x128xf32, #tpu.memory_space<vmem>>, vector<1x2x8x128xf32>
      tpu.vector_store %arg4[%c0_23, %c0_24, %c0_25, %c0_26], %21 {strides = array<i32>} : memref<1x2x8x128xf32, #tpu.memory_space<vmem>>, vector<1x2x8x128xf32>,
    } else {
    }
    %c0 = arith.constant 0 : index
    %c0_1 = arith.constant 0 : index
    %c0_2 = arith.constant 0 : index
    %3 = vector.load %arg2[%c0, %c0_1, %c0_2] : memref<2x8x128xf32, #tpu.memory_space<vmem>>, vector<2x8x128xf32>
    %c0_3 = arith.constant 0 : index
    %c0_4 = arith.constant 0 : index
    %c0_5 = arith.constant 0 : index
    %4 = vector.load %arg3[%c0_3, %c0_4, %c0_5] : memref<2x8x128xf32, #tpu.memory_space<vmem>>, vector<2x8x128xf32>
    %c0_6 = arith.constant 0 : index
    %c0_7 = arith.constant 0 : index
    %c0_8 = arith.constant 0 : index
    %c0_9 = arith.constant 0 : index
    %5 = vector.load %arg4[%c0_6, %c0_7, %c0_8, %c0_9] : memref<1x2x8x128xf32, #tpu.memory_space<vmem>>, vector<1x1x8x128xf32>
    %6 = vector.shape_cast %5 : vector<1x1x8x128xf32> to vector<8x128xf32>
    %7 = arith.mulf %3, %4 : vector<2x8x128xf32>
    %cst = arith.constant dense<0.000000e+00> : vector<8x128xf32>
    %8 = vector.multi_reduction <add>, %7, %cst [0] : vector<2x8x128xf32> to vector<8x128xf32>
    %9 = arith.addf %6, %8 : vector<8x128xf32>
    %c0_10 = arith.constant 0 : index
    %c0_11 = arith.constant 0 : index
    %c0_12 = arith.constant 0 : index
    %c0_13 = arith.constant 0 : index
    %10 = vector.load %arg4[%c0_10, %c0_11, %c0_12, %c0_13] : memref<1x2x8x128xf32, #tpu.memory_space<vmem>>, vector<1x1x8x128xf32>
    %11 = vector.shape_cast %10 : vector<1x1x8x128xf32> to vector<8x128xf32>
    %12 = vector.shape_cast %9 : vector<8x128xf32> to vector<1x1x8x128xf32>
    tpu.vector_store %arg4[%c0_10, %c0_11, %c0_12, %c0_13], %12 {strides = array<i32>} : memref<1x2x8x128xf32, #tpu.memory_space<vmem>>, vector<1x1x8x128xf32>,
    %c0_14 = arith.constant 0 : index
    %c1 = arith.constant 1 : index
    %c0_15 = arith.constant 0 : index
    %c0_16 = arith.constant 0 : index
    %13 = vector.load %arg4[%c0_14, %c1, %c0_15, %c0_16] : memref<1x2x8x128xf32, #tpu.memory_space<vmem>>, vector<1x1x8x128xf32>
    %14 = vector.shape_cast %13 : vector<1x1x8x128xf32> to vector<8x128xf32>
    %15 = arith.addf %3, %4 : vector<2x8x128xf32>
    %cst_17 = arith.constant dense<0.000000e+00> : vector<8x128xf32>
    %16 = vector.multi_reduction <add>, %15, %cst_17 [0] : vector<2x8x128xf32> to vector<8x128xf32>
    %17 = arith.addf %14, %16 : vector<8x128xf32>
    %c0_18 = arith.constant 0 : index
    %c1_19 = arith.constant 1 : index
    %c0_20 = arith.constant 0 : index
    %c0_21 = arith.constant 0 : index
    %18 = vector.load %arg4[%c0_18, %c1_19, %c0_20, %c0_21] : memref<1x2x8x128xf32, #tpu.memory_space<vmem>>, vector<1x1x8x128xf32>
    %19 = vector.shape_cast %18 : vector<1x1x8x128xf32> to vector<8x128xf32>
    %20 = vector.shape_cast %17 : vector<8x128xf32> to vector<1x1x8x128xf32>
    tpu.vector_store %arg4[%c0_18, %c1_19, %c0_20, %c0_21], %20 {strides = array<i32>} : memref<1x2x8x128xf32, #tpu.memory_space<vmem>>, vector<1x1x8x128xf32>,
    return
  }
  func.func @transform_0(%arg0: i32, %arg1: i32) -> (i32, i32, i32) {
    %c1_i32 = arith.constant 1 : i32
    %0 = arith.muli %arg0, %c1_i32 : i32
    %1 = arith.addi %0, %arg1 : i32
    %c0_i32 = arith.constant 0 : i32
    %c0_i32_0 = arith.constant 0 : i32
    %c0_i32_1 = arith.constant 0 : i32
    return %1, %c0_i32, %c0_i32_0 : i32, i32, i32
  }
  func.func @transform_1(%arg0: i32, %arg1: i32) -> (i32, i32, i32) {
    %c1_i32 = arith.constant 1 : i32
    %0 = arith.muli %arg0, %c1_i32 : i32
    %1 = arith.addi %0, %arg1 : i32
    %c0_i32 = arith.constant 0 : i32
    %c0_i32_0 = arith.constant 0 : i32
    %c0_i32_1 = arith.constant 0 : i32
    return %1, %c0_i32, %c0_i32_0 : i32, i32, i32
  }
  func.func @transform_2(%arg0: i32, %arg1: i32) -> (i32, i32, i32, i32) {
    %c0_i32 = arith.constant 0 : i32
    %c0_i32_0 = arith.constant 0 : i32
    %c0_i32_1 = arith.constant 0 : i32
    %c0_i32_2 = arith.constant 0 : i32
    return %arg0, %c0_i32, %c0_i32_0, %c0_i32_1 : i32, i32, i32, i32
  }
}

</mosaic_0001>

<bundles_post_ra>
// kernel: tpu_custom_call.1
= control target key start
LH: loop header
LB: loop body
LE: loop exit
PB: predicated region body
PF: predicated region fallthrough
CT: control target
= control target key end

     0   :  { %7 = vsyncpa [#allocation3], 0  ;;  %s236_s0 = inlined_call_operand.hbm [shape: f32[2,8,128], index: 0, kind: input, shape index: {}]   ;;  %s237_s1 = inlined_call_operand.hbm [shape: f32[2,8,128], index: 1, kind: input, shape index: {}]   ;;  %s238_s2 = inlined_call_operand.hbm [shape: f32[1,2,8,128], index: 2, kind: output, shape index: {}]  }
   0x1   :  { %8 = vsyncpa [#allocation6], 0 }
   0x2   :  { %9 = vsyncpa [#allocation4], 0  ;;  %s171_s9 = smov [#allocation2]   ;;  %s99_s13 = scalar_lea.hbm %s236_s0, 256 }
   0x3   :  { %s19_s10 = sshll.u32 %s171_s9, 4  ;;  %p100_p0 = scmp.ne.s32.totalorder %s236_s0, %s99_s13  ;;  %s20_s10 = int_to_ptr.vmem [resolvable:$true] %s19_s10 }
   0x4   :  { %p103_p1 = scmp.lt.u32.totalorder %s99_s13, %s236_s0 }
   0x6   :  { %p105_p2 = pnand %p103_p1, %p100_p0 }
   0x8   :  { %108 = shalt.err (!%p105_p2)
}
   0x9   :  { %s109_s18 = scalar_lea.vmem %s20_s10, 256  ;;  %p114_p4 = scmp.lt.s32.totalorder %s20_s10, %s20_s10 }
   0xa   :  { %p110_p3 = scmp.ne.s32.totalorder %s20_s10, %s109_s18  ;;  %p115_p5 = scmp.lt.s32.totalorder %s109_s18, %s109_s18 }
   0xc   :  { %p116_p6 = por %p115_p5, %p114_p4 }
   0xe   :  { %p117_p7 = pnand %p116_p6, %p110_p3 }
  0x10   :  { %120 = shalt.err (!%p117_p7)
}
  0x11   :  { %s172_s19 = smov 128   ;;  %s173_s20 = smov 8  }
  0x12   :  { %25 = dma.hbm_to_vmem [thread:$0]  %s236_s0, 256, %s20_s10, [#allocation3], %s172_s19, %s172_s19, %s173_s20  }
  0x13   :  { %s174_s23 = smov [#allocation5]   ;;  %s121_s27 = scalar_lea.hbm %s237_s1, 256 }
  0x14   :  { %s35_s24 = sshll.u32 %s174_s23, 4  ;;  %p122_p8 = scmp.ne.s32.totalorder %s237_s1, %s121_s27  ;;  %s36_s24 = int_to_ptr.vmem [resolvable:$true] %s35_s24 }
  0x15   :  { %p125_p9 = scmp.lt.u32.totalorder %s121_s27, %s237_s1 }
  0x17   :  { %p127_p10 = pnand %p125_p9, %p122_p8 }
  0x19   :  { %130 = shalt.err (!%p127_p10)
}
  0x1a   :  { %s131_s4 = scalar_lea.vmem %s36_s24, 256  ;;  %p136_p12 = scmp.lt.s32.totalorder %s36_s24, %s36_s24 }
  0x1b   :  { %p132_p11 = scmp.ne.s32.totalorder %s36_s24, %s131_s4  ;;  %p137_p13 = scmp.lt.s32.totalorder %s131_s4, %s131_s4 }
  0x1d   :  { %p138_p0 = por %p137_p13, %p136_p12 }
  0x1f   :  { %p139_p1 = pnand %p138_p0, %p132_p11 }
  0x21   :  { %142 = shalt.err (!%p139_p1)
}
  0x22   :  { %41 = dma.hbm_to_vmem [thread:$0]  %s237_s1, 256, %s36_s24, [#allocation6], %s172_s19, %s172_s19, %s173_s20  }
  0x23   :  { %165 = dma.done.wait [#allocation3], 256  }
  0x24   :  { %166 = vsyncadd [#allocation3], 4294967040 }
  0x25   :  { %167 = dma.done.wait [#allocation6], 256  }
  0x26   :  { %168 = vsyncadd [#allocation6], 4294967040  ;;  %v58_v0 = vld [vmem:[#allocation2] sm:$0xff]  ;;  %v59_v1 = vld [vmem:[#allocation2 + $0x8] sm:$0xff]  ;;  %s175_s6 = smov [#allocation7]  }
  0x27   :  { %v60_v2 = vld [vmem:[#allocation5] sm:$0xff]  ;;  %v61_v3 = vld [vmem:[#allocation5 + $0x8] sm:$0xff]  ;;  %s80_s7 = sshll.u32 %s175_s6, 4  ;;  %s81_s7 = int_to_ptr.vmem [resolvable:$true] %s80_s7 }
  0x28   :  { %v63_v4 = vmul.f32 %v60_v2, %v58_v0  ;;  %v70_v5 = vadd.f32 %v60_v2, %v58_v0  ;;  %v64_v6 = vmul.f32 %v61_v3, %v59_v1  ;;  %v71_v7 = vadd.f32 %v61_v3, %v59_v1  ;;  %s143_s1 = scalar_lea.vmem %s81_s7, 256  ;;  %p148_p3 = scmp.lt.s32.totalorder %s81_s7, %s81_s7 }
  0x29   :  { %p144_p2 = scmp.ne.s32.totalorder %s81_s7, %s143_s1  ;;  %p149_p4 = scmp.lt.s32.totalorder %s143_s1, %s143_s1 }
  0x2a   :  { %v65_v8 = vadd.f32 %v64_v6, %v63_v4  ;;  %v72_v9 = vadd.f32 %v71_v7, %v70_v5 }
  0x2b   :  { %p150_p5 = por %p149_p4, %p148_p3 }
  0x2c   :  { %67 = vst [vmem:[#allocation7] sm:$0xff] %v65_v8  ;;  %74 = vst [vmem:[#allocation7 + $0x8] sm:$0xff] %v72_v9 }
  0x2d   :  { %p151_p6 = pnand %p150_p5, %p144_p2 }
  0x2f   :  { %154 = shalt.err (!%p151_p6)
}
  0x30   :  { %s155_s10 = scalar_lea.hbm %s238_s2, 256 }
  0x31   :  { %p156_p7 = scmp.ne.s32.totalorder %s238_s2, %s155_s10  ;;  %p159_p8 = scmp.lt.u32.totalorder %s155_s10, %s238_s2 }
  0x33   :  { %p161_p9 = pnand %p159_p8, %p156_p7 }
  0x35   :  { %164 = shalt.err (!%p161_p9)
}
  0x36   :  { %86 = dma.vmem_to_hbm [thread:$0]  %s81_s7, 256, %s238_s2, [#allocation4], %s172_s19, %s172_s19, %s173_s20  }
  0x37   :  { %169 = dma.done.wait [#allocation4], 256  }
  0x38   :  { %170 = vsyncadd [#allocation4], 4294967040 }
  0x39   :  { %90 = vsyncpa [#allocation3], 1 }
  0x3a   :  { %91 = vsyncpa [#allocation6], 1 }
  0x3b   :  { %92 = vsyncpa [#allocation4], 1 }

</bundles_post_ra>
